<compile_context>
chip_gen: v7x
topology: tpu7x:2x2x1
jax: 0.10.0
libtpu: 0.0.40
codegen_flags: <defaults>
</compile_context>

<pallas_src>
import functools

import jax
import jax.numpy as jnp
from jax.experimental import pallas as pl
from jax.experimental.pallas import tpu as pltpu


# ------------------------------------------------------------------ kernel ---

def _ntm_kernel(idx_ref, bigT_ref, wfp_ref, const_ref, y_ref, *, R, r4, tot):
    # idx_ref: (3, TN) int32, offsets pre-added (user, U+item, U+I+time).
    idx = idx_ref[...]
    tn = idx.shape[1]

    # Combined one-hot over the concatenated (user|item|time) table columns.
    rows = jax.lax.broadcasted_iota(jnp.int32, (tot, tn), 0)
    onehot = ((rows == idx[0:1, :]) |
              (rows == idx[1:2, :]) |
              (rows == idx[2:3, :])).astype(jnp.float32)            # (tot, TN)

    # Single fused gather + fold matmul: block-diagonal bigT guarantees each
    # row-block only picks up its own index column.
    uit = jnp.dot(bigT_ref[...], onehot,
                  preferred_element_type=jnp.float32)               # (3R+3r4, TN)

    uvt_w = uit[0:R]                      # wg-scaled user embedding  (R, TN)
    ivt = uit[R:2 * R]                    # item embedding            (R, TN)
    tvt = uit[2 * R:3 * R]                # time embedding            (R, TN)
    ua = uit[3 * R:3 * R + r4]            # (A2A1) @ user emb         (r4, TN)
    ib = uit[3 * R + r4:3 * R + 2 * r4]   # (B2B1) @ item emb         (r4, TN)
    tc = uit[3 * R + 2 * r4:3 * R + 3 * r4]  # (C2C1) @ time emb      (r4, TN)

    # Generalized component product already contracted with w_out[:R] (wg was
    # folded into the user rows of bigT): VPU multiply + sublane (XLU) reduce.
    score_g = jnp.sum(uvt_w * ivt * tvt, axis=0, keepdims=True)     # (1, TN)

    # Trilinear form  sum_{p,q,r} wf3d[p,q,r] * ua[p,n] * ib[q,n] * tc[r,n]
    z = (ib[:, None, :] * tc[None, :, :]).reshape(r4 * r4, tn)      # (r4^2, TN)
    m = jnp.dot(wfp_ref[...], z, preferred_element_type=jnp.float32)  # (r4, TN)
    score_f = jnp.sum(m * ua, axis=0, keepdims=True)                 # (1, TN)

    # data-independent constant (block2(bias1)+bias2 contracted with wf, + b_out)
    y_ref[...] = jax.nn.sigmoid(score_g + score_f + const_ref[0])


# ----------------------------------------------------------------- wrapper ---

def _fold_params(params):
    """Data-independent weight/bias/table folding (tiny, runs once in plain JAX)."""
    f32 = jnp.float32
    A1, B1, C1 = params["A1"], params["B1"], params["C1"]
    A2, B2, C2 = params["A2"], params["B2"], params["C2"]
    R = A1.shape[1]
    r4 = A2.shape[0]

    WA = (A2 @ A1).astype(f32)                       # (r4, R)
    WB = (B2 @ B1).astype(f32)
    WC = (C2 @ C1).astype(f32)

    wout = params["w_out"].astype(f32)[:, 0]         # (R + r4^3,)
    wg = wout[:R]                                    # (R,)
    wf3d = wout[R:].reshape(r4, r4, r4)              # row-major (p, q, r), r fastest
    WfP = wf3d.reshape(r4, r4 * r4)                  # (r4, r4^2), (q,r) r-fastest

    # block2 applied to bias1, plus bias2, contracted with wf, plus output bias.
    cb = jnp.einsum('pa,qb,rc,abc->pqr', A2, B2, C2, params["bias1"]) + params["bias2"]
    const = (params["b_out"].astype(f32)[0] + jnp.sum(cb.astype(f32) * wf3d)).reshape(1)

    # Block-diagonal fused table (features on sublanes, table rows on lanes).
    uT = params["user_emb"].astype(f32).T            # (R, U)
    iT = params["item_emb"].astype(f32).T            # (R, I)
    tT = params["time_emb"].astype(f32).T            # (R, T)
    U, I, T = uT.shape[1], iT.shape[1], tT.shape[1]
    tot = U + I + T

    bigT = jnp.zeros((3 * R + 3 * r4, tot), f32)
    bigT = bigT.at[0:R, 0:U].set(wg[:, None] * uT)            # wg folded in
    bigT = bigT.at[R:2 * R, U:U + I].set(iT)
    bigT = bigT.at[2 * R:3 * R, U + I:tot].set(tT)
    bigT = bigT.at[3 * R:3 * R + r4, 0:U].set(WA @ uT)        # folded TMLP factors
    bigT = bigT.at[3 * R + r4:3 * R + 2 * r4, U:U + I].set(WB @ iT)
    bigT = bigT.at[3 * R + 2 * r4:3 * R + 3 * r4, U + I:tot].set(WC @ tT)

    return bigT, WfP, const, (R, r4, U, I, T)


def neural_tensor_forward(user, item, time, params, tile_n=8192):
    assert tile_n % 128 == 0, "tile_n must be a multiple of 128 (lane width)"
    bigT, WfP, const, (R, r4, U, I, T) = _fold_params(params)
    tot = U + I + T
    N = user.shape[0]

    # Lane-dense batch tiling: big tiles amortize the ~0.35us per-grid-step cost.
    n128 = max(128, pl.cdiv(N, 128) * 128)
    tn = min(tile_n, n128)
    n_pad = pl.cdiv(N, tn) * tn

    def pad(x):
        x = jnp.asarray(x, jnp.int32)
        if x.shape[0] == n_pad:
            return x
        return jnp.concatenate([x, jnp.zeros((n_pad - x.shape[0],), jnp.int32)])

    # Stack indices (offsets pre-added) so one DMA per step carries all three.
    idx = jnp.stack([pad(user), pad(item) + U, pad(time) + U + I])   # (3, n_pad) i32

    kernel = functools.partial(_ntm_kernel, R=R, r4=r4, tot=tot)

    y = pl.pallas_call(
        kernel,
        grid=(n_pad // tn,),
        in_specs=[
            pl.BlockSpec((3, tn), lambda i: (0, i)),            # streamed indices
            pl.BlockSpec(bigT.shape, lambda i: (0, 0)),         # VMEM-resident table
            pl.BlockSpec(WfP.shape, lambda i: (0, 0)),          # VMEM-resident weight
            pl.BlockSpec(memory_space=pltpu.MemorySpace.SMEM),  # scalar constant
        ],
        out_specs=pl.BlockSpec((1, tn), lambda i: (0, i)),      # lane-dense output
        out_shape=jax.ShapeDtypeStruct((1, n_pad), jnp.float32),
        compiler_params=pltpu.CompilerParams(
            dimension_semantics=("parallel",),
            vmem_limit_bytes=40 * 1024 * 1024,                  # big tiles on v5e too
        ),
    )(idx, bigT, WfP, const)

    return y[0, :N]                                             # matches torch .flatten()


# ----------------------------------------------------- pure-JAX reference ---

def reference_forward(user, item, time, params):
    uv = params["user_emb"][user]
    iv = params["item_emb"][item]
    tv = params["time_emb"][time]
    gcp = uv * iv * tv
    x = jnp.einsum('ni,nj,nk->nijk', uv, iv, tv)
    for A, B, C, b in ((params["A1"], params["B1"], params["C1"], params["bias1"]),
                       (params["A2"], params["B2"], params["C2"], params["bias2"])):
        x = jnp.einsum('nijk,ri->nrjk', x, A)
        x = jnp.einsum('nijk,rj->nirk', x, B)
        x = jnp.einsum('nijk,rk->nijr', x, C)
        x = x + b
    rep = jnp.concatenate([gcp, x.reshape(x.shape[0], -1)], axis=-1)
    y = jax.nn.sigmoid(rep @ params["w_out"] + params["b_out"])
    return y.reshape(-1)


# -------------------------------------------------------------------- main ---

if __name__ == "__main__":
    key = jax.random.PRNGKey(0)
    ks = jax.random.split(key, 16)

    # args: num_users=10, num_items=12, num_times=14, rank=32
    num_users, num_items, num_times = 10, 12, 14
    rank = 32
    r2, r4 = rank // 2, rank // 4
    feat = rank + r4 ** 3                            # LazyLinear in_features = 544
    N = 8                                            # batch

    params = {
        "user_emb": 0.5 * jax.random.normal(ks[0], (num_users, rank), jnp.float32),
        "item_emb": 0.5 * jax.random.normal(ks[1], (num_items, rank), jnp.float32),
        "time_emb": 0.5 * jax.random.normal(ks[2], (num_times, rank), jnp.float32),
        # TMLPBlock(rank, rank//2)
        "A1": 0.1 * jax.random.normal(ks[3], (r2, rank), jnp.float32),
        "B1": 0.1 * jax.random.normal(ks[4], (r2, rank), jnp.float32),
        "C1": 0.1 * jax.random.normal(ks[5], (r2, rank), jnp.float32),
        "bias1": 0.02 * jax.random.normal(ks[6], (r2, r2, r2), jnp.float32),
        # TMLPBlock(rank//2, rank//4)
        "A2": 0.1 * jax.random.normal(ks[7], (r4, r2), jnp.float32),
        "B2": 0.1 * jax.random.normal(ks[8], (r4, r2), jnp.float32),
        "C2": 0.1 * jax.random.normal(ks[9], (r4, r2), jnp.float32),
        "bias2": 0.02 * jax.random.normal(ks[10], (r4, r4, r4), jnp.float32),
        # LazyLinear(1) + Sigmoid
        "w_out": 0.05 * jax.random.normal(ks[11], (feat, 1), jnp.float32),
        "b_out": 0.01 * jnp.ones((1,), jnp.float32),
    }

    user = jax.random.randint(ks[12], (N,), 0, num_users)
    item = jax.random.randint(ks[13], (N,), 0, num_items)
    time = jax.random.randint(ks[14], (N,), 0, num_times)

    y = neural_tensor_forward(user, item, time, params)
    jax.block_until_ready(y)

    y_ref = reference_forward(user, item, time, params)
    assert y.shape == (N,)
    assert jnp.allclose(y, y_ref, rtol=2e-3, atol=2e-3), (y, y_ref)

    print("KERNEL_OK")
</pallas_src>

<mosaic_0001>
module attributes {stable_mosaic.version = 11 : i64} {
  func.func @_ntm_kernel(%arg0: i32, %arg1: memref<3x128xi32, #tpu.memory_space<vmem>>, %arg2: memref<120x36xf32, #tpu.memory_space<vmem>>, %arg3: memref<8x64xf32, #tpu.memory_space<vmem>>, %arg4: memref<1xf32, #tpu.memory_space<smem>>, %arg5: memref<1x128xf32, #tpu.memory_space<vmem>>) attributes {dimension_semantics = [#tpu.dimension_semantics<parallel>], iteration_bounds = array<i64: 1>, scalar_prefetch = 0 : i64, scratch_operands = 0 : i64, tpu.core_type = #tpu.core_type<tc>, window_params = [{transform_indices = @transform_0, window_bounds = array<i64: 3, 128>}, {pipeline_mode = #tpu.pipeline_mode<synchronous>, transform_indices = @transform_1, window_bounds = array<i64: 120, 36>}, {pipeline_mode = #tpu.pipeline_mode<synchronous>, transform_indices = @transform_2, window_bounds = array<i64: 8, 64>}, {transform_indices = @transform_3, window_bounds = array<i64: 1>}, {transform_indices = @transform_4, window_bounds = array<i64: 1, 128>}]} {
    %c0 = arith.constant 0 : index
    %c0_0 = arith.constant 0 : index
    %0 = vector.load %arg1[%c0, %c0_0] : memref<3x128xi32, #tpu.memory_space<vmem>>, vector<3x128xi32>
    %1 = tpu.iota {dimensions = array<i32: 0>} : vector<36x128xi32>
    %2 = vector.extract_strided_slice %0 {offsets = [0, 0], sizes = [1, 128], strides = [1, 1]} : vector<3x128xi32> to vector<1x128xi32>
    %3 = vector.broadcast %2 : vector<1x128xi32> to vector<36x128xi32>
    %4 = arith.cmpi eq, %1, %3 : vector<36x128xi32>
    %5 = vector.extract_strided_slice %0 {offsets = [1, 0], sizes = [1, 128], strides = [1, 1]} : vector<3x128xi32> to vector<1x128xi32>
    %6 = vector.broadcast %5 : vector<1x128xi32> to vector<36x128xi32>
    %7 = arith.cmpi eq, %1, %6 : vector<36x128xi32>
    %8 = arith.ori %4, %7 : vector<36x128xi1>
    %9 = vector.extract_strided_slice %0 {offsets = [2, 0], sizes = [1, 128], strides = [1, 1]} : vector<3x128xi32> to vector<1x128xi32>
    %10 = vector.broadcast %9 : vector<1x128xi32> to vector<36x128xi32>
    %11 = arith.cmpi eq, %1, %10 : vector<36x128xi32>
    %12 = arith.ori %8, %11 : vector<36x128xi1>
    %13 = arith.extui %12 : vector<36x128xi1> to vector<36x128xi32>
    %14 = arith.sitofp %13 : vector<36x128xi32> to vector<36x128xf32>
    %c0_1 = arith.constant 0 : index
    %c0_2 = arith.constant 0 : index
    %15 = vector.load %arg2[%c0_1, %c0_2] : memref<120x36xf32, #tpu.memory_space<vmem>>, vector<120x36xf32>
    %cst = arith.constant dense<0.000000e+00> : vector<120x128xf32>
    %16 = tpu.matmul %15, %14, %cst {dimension_numbers = #tpu.dot_dimension_numbers<[1], [0], [0], [1], [0, 0, 1, 1], [], []>} : vector<120x36xf32>, vector<36x128xf32>, vector<120x128xf32> -> vector<120x128xf32>
    %17 = vector.extract_strided_slice %16 {offsets = [0, 0], sizes = [32, 128], strides = [1, 1]} : vector<120x128xf32> to vector<32x128xf32>
    %18 = vector.extract_strided_slice %16 {offsets = [32, 0], sizes = [32, 128], strides = [1, 1]} : vector<120x128xf32> to vector<32x128xf32>
    %19 = vector.extract_strided_slice %16 {offsets = [64, 0], sizes = [32, 128], strides = [1, 1]} : vector<120x128xf32> to vector<32x128xf32>
    %20 = vector.extract_strided_slice %16 {offsets = [96, 0], sizes = [8, 128], strides = [1, 1]} : vector<120x128xf32> to vector<8x128xf32>
    %21 = vector.extract_strided_slice %16 {offsets = [104, 0], sizes = [8, 128], strides = [1, 1]} : vector<120x128xf32> to vector<8x128xf32>
    %22 = vector.extract_strided_slice %16 {offsets = [112, 0], sizes = [8, 128], strides = [1, 1]} : vector<120x128xf32> to vector<8x128xf32>
    %23 = arith.mulf %17, %18 : vector<32x128xf32>
    %24 = arith.mulf %23, %19 : vector<32x128xf32>
    %cst_3 = arith.constant dense<0.000000e+00> : vector<128xf32>
    %25 = vector.multi_reduction <add>, %24, %cst_3 [0] : vector<32x128xf32> to vector<128xf32>
    %26 = vector.shape_cast %25 : vector<128xf32> to vector<1x128xf32>
    %27 = vector.shape_cast %21 : vector<8x128xf32> to vector<8x1x128xf32>
    %28 = vector.shape_cast %22 : vector<8x128xf32> to vector<1x8x128xf32>
    %29 = vector.broadcast %27 : vector<8x1x128xf32> to vector<8x8x128xf32>
    %30 = vector.broadcast %28 : vector<1x8x128xf32> to vector<8x8x128xf32>
    %31 = arith.mulf %29, %30 : vector<8x8x128xf32>
    %32 = vector.shape_cast %31 : vector<8x8x128xf32> to vector<64x128xf32>
    %c0_4 = arith.constant 0 : index
    %c0_5 = arith.constant 0 : index
    %33 = vector.load %arg3[%c0_4, %c0_5] : memref<8x64xf32, #tpu.memory_space<vmem>>, vector<8x64xf32>
    %cst_6 = arith.constant dense<0.000000e+00> : vector<8x128xf32>
    %34 = tpu.matmul %33, %32, %cst_6 {dimension_numbers = #tpu.dot_dimension_numbers<[1], [0], [0], [1], [0, 0, 1, 1], [], []>} : vector<8x64xf32>, vector<64x128xf32>, vector<8x128xf32> -> vector<8x128xf32>
    %35 = arith.mulf %34, %20 : vector<8x128xf32>
    %cst_7 = arith.constant dense<0.000000e+00> : vector<128xf32>
    %36 = vector.multi_reduction <add>, %35, %cst_7 [0] : vector<8x128xf32> to vector<128xf32>
    %37 = vector.shape_cast %36 : vector<128xf32> to vector<1x128xf32>
    %38 = arith.addf %26, %37 : vector<1x128xf32>
    %c0_8 = arith.constant 0 : index
    %39 = memref.load %arg4[%c0_8] : memref<1xf32, #tpu.memory_space<smem>>
    %40 = vector.broadcast %39 : f32 to vector<1x128xf32>
    %41 = arith.addf %38, %40 : vector<1x128xf32>
    %42 = arith.negf %41 : vector<1x128xf32>
    %43 = math.exp %42 : vector<1x128xf32>
    %cst_9 = arith.constant 1.000000e+00 : f32
    %44 = vector.broadcast %cst_9 : f32 to vector<1x128xf32>
    %45 = arith.addf %44, %43 : vector<1x128xf32>
    %46 = arith.divf %44, %45 : vector<1x128xf32>
    %c0_10 = arith.constant 0 : index
    %c0_11 = arith.constant 0 : index
    %47 = vector.load %arg5[%c0_10, %c0_11] : memref<1x128xf32, #tpu.memory_space<vmem>>, vector<1x128xf32>
    tpu.vector_store %arg5[%c0_10, %c0_11], %46 {strides = array<i32>} : memref<1x128xf32, #tpu.memory_space<vmem>>, vector<1x128xf32>,
    return
  }
  func.func @transform_0(%arg0: i32) -> (i32, i32) {
    %c0_i32 = arith.constant 0 : i32
    %c0_i32_0 = arith.constant 0 : i32
    return %c0_i32, %arg0 : i32, i32
  }
  func.func @transform_1(%arg0: i32) -> (i32, i32) {
    %c0_i32 = arith.constant 0 : i32
    %c0_i32_0 = arith.constant 0 : i32
    %c0_i32_1 = arith.constant 0 : i32
    return %c0_i32, %c0_i32_0 : i32, i32
  }
  func.func @transform_2(%arg0: i32) -> (i32, i32) {
    %c0_i32 = arith.constant 0 : i32
    %c0_i32_0 = arith.constant 0 : i32
    %c0_i32_1 = arith.constant 0 : i32
    return %c0_i32, %c0_i32_0 : i32, i32
  }
  func.func @transform_3(%arg0: i32) -> i32 {
    %c0_i32 = arith.constant 0 : i32
    %c0_i32_0 = arith.constant 0 : i32
    return %c0_i32 : i32
  }
  func.func @transform_4(%arg0: i32) -> (i32, i32) {
    %c0_i32 = arith.constant 0 : i32
    %c0_i32_0 = arith.constant 0 : i32
    return %c0_i32, %arg0 : i32, i32
  }
}

</mosaic_0001>

<bundles_post_ra>
// kernel: tpu_custom_call.1
= control target key start
LH: loop header
LB: loop body
LE: loop exit
PB: predicated region body
PF: predicated region fallthrough
CT: control target
= control target key end

     0   :  { %v20_v0 = vlaneseq  ;;  %v688_v1 = vmov 0.0|0.0   ;;  %vm875_vm0 = vmmov 0   ;;  %v690_v3 = vmov 0.0   ;;  %s870_s0 = inlined_call_operand.vmem [shape: s32[3,128], index: 0, kind: input, shape index: {}]   ;;  %s871_s1 = inlined_call_operand.vmem [shape: f32[120,36], index: 1, kind: input, shape index: {}]   ;;  %s872_s2 = inlined_call_operand.vmem [shape: f32[8,64], index: 2, kind: input, shape index: {}]   ;;  %s873_s3 = inlined_call_operand.<no memory space> [shape: f32[1], index: 3, kind: input, shape index: {}]   ;;  %s874_s4 = inlined_call_operand.hbm [shape: f32[1,128], index: 4, kind: output, shape index: {}]  }
   0x1   :  { %630 = vmatprep.subr.bf16.mxu0 %v688_v1  ;;  %648 = vmatprep.subr.bf16.mxu1 %v688_v1  ;;  %v19_v4 = vld [vmem:[%s870_s0] sm:$0x7] }
   0x2   :  { %v721_v2 = vshrl.u32 %v20_v0, 7  ;;  %566 = vmatprep.mubr.msk.f32.mxu0 %vm875_vm0, %v690_v3  ;;  %590 = vmatprep.mubr.msk.f32.mxu1 %vm875_vm0, %v690_v3 }
   0x4   :  { %v22_v5 = vadd.s32 8, %v721_v2  ;;  %v732_v6 = vsub.s32 0, %v721_v2  ;;  %v37_v7 = vsub.s32 1, %v721_v2  ;;  %v51_v8 = vsub.s32 2, %v721_v2 }
   0x6   :  { %v29_v9 = vrot.slane %v19_v4, %v732_v6  ;;  %v38_v10 = vrot.slane %v19_v4, %v37_v7  ;;  %v52_v11 = vrot.slane %v19_v4, %v51_v8 }
   0x7   :  { %10 = vsyncpa [#allocation4], 0  ;;  %v23_v12 = vadd.s32 16, %v721_v2  ;;  %v24_v13 = vadd.s32 24, %v721_v2  ;;  %v25_v14 = vadd.s32 32, %v721_v2  ;;  %v73_v17 = vld [vmem:[%s871_s1] sm:$0xff] }
   0x8   :  { %vm30_vm1 = vcmp.eq.s32.totalorder %v721_v2, %v29_v9  ;;  %vm31_vm2 = vcmp.eq.s32.totalorder %v22_v5, %v29_v9  ;;  %vm39_vm3 = vcmp.eq.s32.totalorder %v721_v2, %v38_v10  ;;  %vm40_vm4 = vcmp.eq.s32.totalorder %v22_v5, %v38_v10  ;;  %v81_v18 = vld [vmem:[%s871_s1 + $0x40] sm:$0xff]  ;;  %v74_v19 = vld [vmem:[%s871_s1 + $0x8] sm:$0xff]  ;;  %v75_v21 = vld [vmem:[%s871_s1 + $0x10] sm:$0xff]  ;;  %s693_s21 = smov [#allocation3]  }
   0x9   :  { %vm44_vm5 = vmor %vm30_vm1, %vm39_vm3  ;;  %vm53_vm6 = vcmp.eq.s32.totalorder %v721_v2, %v52_v11  ;;  %vm54_vm7 = vcmp.eq.s32.totalorder %v22_v5, %v52_v11  ;;  %vm32_vm10 = vcmp.eq.s32.totalorder %v23_v12, %v29_v9  ;;  %vm41_vm11 = vcmp.eq.s32.totalorder %v23_v12, %v38_v10  ;;  %v82_v20 = vld [vmem:[%s871_s1 + $0x48] sm:$0xff]  ;;  %v83_v22 = vld [vmem:[%s871_s1 + $0x50] sm:$0xff]  ;;  %s492_s22 = sshll.u32 %s693_s21, 4  ;;  %s493_s22 = int_to_ptr.vmem [resolvable:$true] %s492_s22 }
   0xa   :  { %vm45_vm8 = vmor %vm31_vm2, %vm40_vm4  ;;  %vm33_vm13 = vcmp.eq.s32.totalorder %v24_v13, %v29_v9  ;;  %vm42_vm14 = vcmp.eq.s32.totalorder %v24_v13, %v38_v10  ;;  %vm55_vm0 = vcmp.eq.s32.totalorder %v23_v12, %v52_v11  ;;  %v691_v15 = vmov 1.0|1.0   ;;  %v76_v23 = vld [vmem:[%s871_s1 + $0x18] sm:$0xff]  ;;  %v77_v25 = vld [vmem:[%s871_s1 + $0x20] sm:$0xff]  ;;  %s664_s23 = scalar_lea.vmem %s493_s22, 16  ;;  %s668_s24 = scalar_lea.vmem %s493_s22, 32 }
   0xb   :  { %vm58_vm9 = vmor %vm44_vm5, %vm53_vm6  ;;  %vm56_vm3 = vcmp.eq.s32.totalorder %v24_v13, %v52_v11  ;;  %vm34_vm5 = vcmp.eq.s32.totalorder %v25_v14, %v29_v9  ;;  %vm43_vm6 = vcmp.eq.s32.totalorder %v25_v14, %v38_v10  ;;  %v84_v24 = vld [vmem:[%s871_s1 + $0x58] sm:$0xff]  ;;  %v85_v26 = vld [vmem:[%s871_s1 + $0x60] sm:$0xff]  ;;  %v692_v44 = vmov 1966171168   ;;  %p665_p0 = scmp.ne.s32.totalorder %s493_s22, %s664_s23  ;;  %p669_p1 = scmp.lt.s32.totalorder %s493_s22, %s493_s22 }
   0xc   :  { %vm59_vm12 = vmor %vm45_vm8, %vm54_vm7  ;;  %vm57_vm8 = vcmp.eq.s32.totalorder %v25_v14, %v52_v11  ;;  %v78_v27 = vld [vmem:[%s871_s1 + $0x28] sm:$0xff]  ;;  %v79_v29 = vld [vmem:[%s871_s1 + $0x30] sm:$0xff]  ;;  %v298_v45 = vunpack.c.l.s4 %v692_v44  ;;  %p670_p2 = scmp.lt.s32.totalorder %s668_s24, %s664_s23 }
   0xd   :  { %vm631_vm15 = vmpackc.low %vm59_vm12, %vm58_vm9  ;;  %v86_v28 = vld [vmem:[%s871_s1 + $0x68] sm:$0xff]  ;;  %v87_v30 = vld [vmem:[%s871_s1 + $0x70] sm:$0xff] }
   0xe   :  { %632 = vmatpush3.bf16.msk.msra.mxu0 %vm631_vm15, %v691_v15  ;;  %651 = vmatpush3.bf16.msk.msra.mxu1 %vm631_vm15, %v691_v15  ;;  %vm46_vm1 = vmor %vm32_vm10, %vm41_vm11  ;;  %vm134_vm11 = vcmask 1043456   ;;  %v80_v31 = vld [vmem:[%s871_s1 + $0x38] sm:$0xff]  ;;  %v299_v50 = vunpack.c.0.s8 %v298_v45  ;;  %p671_p3 = por %p670_p2, %p669_p1 }
   0xf   :  { %633 = vmatprep.subr.bf16.mxu0 %v688_v1  ;;  %649 = vmatprep.subr.bf16.mxu1 %v688_v1  ;;  %vm47_vm2 = vmor %vm33_vm13, %vm42_vm14  ;;  %vm877_vm13 = vmmov 0   ;;  %vm394_vm14 = vcmask 523264  }
  0x10   :  { %vm60_vm4 = vmor %vm46_vm1, %vm55_vm0  ;;  %vm88_vm0 = vcmask 293888   ;;  %v302_v56 = vsub.s32 %v299_v50, %v721_v2  ;;  %p672_p4 = pnand %p671_p3, %p665_p0 }
  0x11   :  { %vm61_vm7 = vmor %vm47_vm2, %vm56_vm3 }
  0x12   :  { %vm634_vm9 = vmpackc.low %vm61_vm7, %vm60_vm4 }
  0x13   :  { %635 = vmatpush3.bf16.msk.msra.mxu0 %vm634_vm9, %v691_v15  ;;  %652 = vmatpush3.bf16.msk.msra.mxu1 %vm634_vm9, %v691_v15  ;;  %vm48_vm12 = vmor %vm34_vm5, %vm43_vm6 }
  0x14   :  { %564 = vmatprep.subr.mxu0 %v690_v3  ;;  %650 = vmatprep.subr.mxu1 %v690_v3  ;;  %vm62_vm10 = vmor %vm48_vm12, %vm57_vm8 }
  0x15   :  { %v504_v16 = vsel %vm62_vm10, 1.0, %v690_v3 }
  0x17   :  { %565 = vmatpush3.msk.msra.mxu0 %vm134_vm11, %v504_v16  ;;  %653 = vmatpush3.msk.msra.mxu1 %vm134_vm11, %v504_v16 }
  0x18   :  { %567 = vmatmul.mubr.msk.f32.vlgmr.msra.gmra.mrb[0].mxu0 %vm88_vm0, %v73_v17  ;;  %591 = vmatmul.mubr.msk.f32.vlgmr.msra.gmra.mrb[0].mxu1 %vm88_vm0, %v81_v18 }
  0x19   :  { %569 = vmatprep.mubr.msk.f32.mxu0 %vm877_vm13, %v690_v3  ;;  %593 = vmatprep.mubr.msk.f32.mxu1 %vm877_vm13, %v690_v3 }
  0x1a   :  { %636 = vmatprep.subr.bf16.mxu1 %v688_v1 }
  0x1c   :  { %570 = vmatmul.mubr.msk.f32.gmra.mrb[2].mxu0 %vm88_vm0, %v74_v19  ;;  %594 = vmatmul.mubr.msk.f32.gmra.mrb[2].mxu1 %vm88_vm0, %v82_v20 }
  0x1d   :  { %572 = vmatprep.mubr.msk.f32.mxu0 %vm877_vm13, %v690_v3  ;;  %596 = vmatprep.mubr.msk.f32.mxu1 %vm877_vm13, %v690_v3 }
  0x20   :  { %573 = vmatmul.mubr.msk.f32.gmra.mrb[4].mxu0 %vm88_vm0, %v75_v21  ;;  %597 = vmatmul.mubr.msk.f32.gmra.mrb[4].mxu1 %vm88_vm0, %v83_v22 }
  0x21   :  { %575 = vmatprep.mubr.msk.f32.mxu0 %vm877_vm13, %v690_v3  ;;  %599 = vmatprep.mubr.msk.f32.mxu1 %vm877_vm13, %v690_v3 }
  0x24   :  { %576 = vmatmul.mubr.msk.f32.gmra.mrb[6].mxu0 %vm88_vm0, %v76_v23  ;;  %600 = vmatmul.mubr.msk.f32.gmra.mrb[6].mxu1 %vm88_vm0, %v84_v24 }
  0x25   :  { %578 = vmatprep.mubr.msk.f32.mxu0 %vm877_vm13, %v690_v3  ;;  %602 = vmatprep.mubr.msk.f32.mxu1 %vm877_vm13, %v690_v3 }
  0x28   :  { %579 = vmatmul.mubr.msk.f32.gmra.mrb[8].mxu0 %vm88_vm0, %v77_v25  ;;  %603 = vmatmul.mubr.msk.f32.gmra.mrb[8].mxu1 %vm88_vm0, %v85_v26 }
  0x29   :  { %581 = vmatprep.mubr.msk.f32.mxu0 %vm877_vm13, %v690_v3  ;;  %605 = vmatprep.mubr.msk.f32.mxu1 %vm877_vm13, %v690_v3 }
  0x2c   :  { %582 = vmatmul.mubr.msk.f32.gmra.mrb[10].mxu0 %vm88_vm0, %v78_v27  ;;  %606 = vmatmul.mubr.msk.f32.gmra.mrb[10].mxu1 %vm88_vm0, %v86_v28 }
  0x2d   :  { %584 = vmatprep.mubr.msk.f32.mxu0 %vm877_vm13, %v690_v3  ;;  %608 = vmatprep.mubr.msk.f32.mxu1 %vm877_vm13, %v690_v3 }
  0x30   :  { %585 = vmatmul.mubr.msk.f32.gmra.mrb[12].mxu0 %vm88_vm0, %v79_v29  ;;  %609 = vmatmul.mubr.msk.f32.gmra.mrb[12].mxu1 %vm88_vm0, %v87_v30 }
  0x31   :  { %587 = vmatprep.mubr.msk.f32.mxu0 %vm877_vm13, %v690_v3  ;;  %627 = vmatprep.mubr.msk.f32.mxu1 %vm877_vm13, %v690_v3 }
  0x34   :  { %588 = vmatmul.mubr.msk.f32.gmra.mrb[14].mxu0 %vm88_vm0, %v80_v31 }
  0xeb   :  { %v244_v32 = vpop.f32.mrb[0].mxu1  ;;  %v204_v33 = vpop.f32.mrb[0].mxu0 }
  0xec   :  { %v592_v34 = vpop.f32.mrb[1].mxu1  ;;  %v568_v35 = vpop.f32.mrb[1].mxu0 }
  0xef   :  { %v249_v36 = vpop.f32.mrb[2].mxu1  ;;  %v209_v37 = vpop.f32.mrb[2].mxu0 }
  0xf0   :  { %v595_v38 = vpop.f32.mrb[3].mxu1  ;;  %v571_v39 = vpop.f32.mrb[3].mxu0 }
  0xf3   :  { %v254_v40 = vpop.f32.mrb[4].mxu1  ;;  %v214_v41 = vpop.f32.mrb[4].mxu0 }
  0xf4   :  { %v598_v42 = vpop.f32.mrb[5].mxu1  ;;  %v574_v43 = vpop.f32.mrb[5].mxu0 }
  0xf7   :  { %v259_v46 = vpop.f32.mrb[6].mxu1  ;;  %v219_v47 = vpop.f32.mrb[6].mxu0 }
  0xf8   :  { %v601_v48 = vpop.f32.mrb[7].mxu1  ;;  %v577_v49 = vpop.f32.mrb[7].mxu0 }
  0xfb   :  { %v224_v51 = vpop.f32.mrb[8].mxu0  ;;  %v837_v52 = vpop.f32.mrb[8].mxu1 }
  0xfc   :  { %v278_v53 = vmul.f32 %v224_v51, %v204_v33  ;;  %v604_v54 = vpop.f32.mrb[9].mxu1  ;;  %v580_v55 = vpop.f32.mrb[9].mxu0 }
  0xfe   :  { %v282_v57 = vmul.f32 %v278_v53, %v244_v32 }
  0xff   :  { %v229_v58 = vpop.f32.mrb[10].mxu0  ;;  %v269_v59 = vpop.f32.mrb[10].mxu1 }
 0x100   :  { %v279_v60 = vmul.f32 %v229_v58, %v209_v37  ;;  %v296_v61 = vcombine.high %v269_v59, %v269_v59  ;;  %v303_v62 = vrot.slane %v269_v59, %v302_v56  ;;  %v607_v63 = vpop.f32.mrb[11].mxu1  ;;  %v583_v0 = vpop.f32.mrb[11].mxu0 }
 0x101   :  { %v477_v63 = vstv %s873_s3 }
 0x102   :  { %v283_v3 = vmul.f32 %v279_v60, %v249_v36  ;;  %v310_v4 = vrot.slane %v296_v61, %v302_v56  ;;  %v311_v5 = vcombine.high %v303_v62, %v303_v62  ;;  %v319_v7 = vrot.slane %v303_v62, %v302_v56 }
 0x103   :  { %v234_v8 = vpop.f32.mrb[12].mxu0  ;;  %v274_v9 = vpop.f32.mrb[12].mxu1 }
 0x104   :  { %v286_v10 = vadd.f32 %v283_v3, %v282_v57  ;;  %v312_v11 = vcombine.high %v310_v4, %v310_v4  ;;  %v326_v12 = vrot.slane %v310_v4, %v302_v56  ;;  %v333_v13 = vrot.slane %v311_v5, %v302_v56  ;;  %v586_v14 = vpop.f32.mrb[13].mxu0  ;;  %v610_v2 = vpop.f32.mrb[13].mxu1 }
 0x105   :  { %v341_v15 = vcombine.high %v319_v7, %v319_v7  ;;  %v348_v16 = vrot.slane %v319_v7, %v732_v6  ;;  %v280_v17 = vmul.f32 %v234_v8, %v214_v41 }
 0x106   :  { %v340_v18 = vrot.slane %v312_v11, %v302_v56  ;;  %v342_v19 = vcombine.high %v326_v12, %v326_v12  ;;  %v343_v20 = vcombine.high %v333_v13, %v333_v13  ;;  %v352_v21 = vrot.slane %v333_v13, %v732_v6 }
 0x107   :  { %v356_v22 = vrot.slane %v341_v15, %v732_v6  ;;  %v364_v23 = vrot.slane %v326_v12, %v732_v6  ;;  %v284_v24 = vmul.f32 %v280_v17, %v254_v40  ;;  %v239_v25 = vpop.f32.mrb[14].mxu0  ;;  %v385_v26 = vmul.f32 %v348_v16, %v274_v9 }
 0x108   :  { %v344_v27 = vcombine.high %v340_v18, %v340_v18  ;;  %v360_v28 = vrot.slane %v343_v20, %v732_v6  ;;  %v368_v29 = vrot.slane %v340_v18, %v732_v6  ;;  %v372_v30 = vrot.slane %v342_v19, %v732_v6  ;;  %v589_v31 = vpop.f32.mrb[15].mxu0 }
 0x109   :  { %v287_v32 = vadd.f32 %v286_v10, %v284_v24  ;;  %v281_v33 = vmul.f32 %v239_v25, %v219_v47  ;;  %v386_v34 = vmul.f32 %v352_v21, %v274_v9  ;;  %v387_v35 = vmul.f32 %v356_v22, %v274_v9 }
 0x10a   :  { %v388_v36 = vmul.f32 %v360_v28, %v274_v9  ;;  %v389_v37 = vmul.f32 %v364_v23, %v274_v9  ;;  %v390_v38 = vmul.f32 %v368_v29, %v274_v9  ;;  %v376_v39 = vrot.slane %v344_v27, %v732_v6  ;;  %v393_v6 = vld [vmem:[%s872_s2] sm:$0xff] }
 0x10b   :  { %v285_v40 = vmul.f32 %v281_v33, %v259_v46  ;;  %v637_v41 = vpack.c.bf16 %v386_v34, %v385_v26  ;;  %v391_v42 = vmul.f32 %v372_v30, %v274_v9 }
 0x10c   :  { %v640_v43 = vpack.c.bf16 %v388_v36, %v387_v35  ;;  %v643_v44 = vpack.c.bf16 %v390_v38, %v389_v37  ;;  %v392_v45 = vmul.f32 %v376_v39, %v274_v9 }
 0x10d   :  { %v288_v48 = vadd.f32 %v287_v32, %v285_v40  ;;  %638 = vmatpush3.bf16.msra.mxu1 %v637_v41 }
 0x10e   :  { %639 = vmatprep.subr.bf16.mxu1 %v688_v1  ;;  %v646_v49 = vpack.c.bf16 %v392_v45, %v391_v42 }
 0x10f   :  { %v289_v46 = vrot.slane %v288_v48, 4 }
 0x111   :  { %641 = vmatpush3.bf16.msra.mxu1 %v640_v43  ;;  %v290_v47 = vadd.f32 %v289_v46, %v288_v48 }
 0x112   :  { %642 = vmatprep.subr.bf16.mxu1 %v688_v1 }
 0x113   :  { %v291_v51 = vrot.slane %v290_v47, 2 }
 0x115   :  { %644 = vmatpush3.bf16.msra.mxu1 %v643_v44  ;;  %v292_v56 = vadd.f32 %v291_v51, %v290_v47 }
 0x116   :  { %645 = vmatprep.subr.bf16.mxu1 %v688_v1 }
 0x117   :  { %v293_v59 = vrot.slane %v292_v56, 1 }
 0x119   :  { %647 = vmatpush3.bf16.msra.mxu1 %v646_v49  ;;  %v294_v61 = vadd.f32 %v293_v59, %v292_v56 }
 0x11c   :  { %628 = vmatmul.mubr.msk.f32.vlgmr.msra.gmra.mrb[14].mxu1 %vm394_vm14, %v393_v6 }
 0x1ef   :  { %v464_v50 = vpop.f32.mrb[14].mxu1 }
 0x1f0   :  { %v468_v53 = vmul.f32 %v464_v50, %v837_v52  ;;  %v629_v54 = vpop.f32.mrb[15].mxu1 }
 0x1f2   :  { %v469_v55 = vrot.slane %v468_v53, 4 }
 0x1f4   :  { %v470_v57 = vadd.f32 %v469_v55, %v468_v53 }
 0x1f6   :  { %v471_v58 = vrot.slane %v470_v57, 2 }
 0x1f8   :  { %v472_v1 = vadd.f32 %v471_v58, %v470_v57 }
 0x1fa   :  { %v473_v60 = vrot.slane %v472_v1, 1 }
 0x1fc   :  { %v474_v62 = vadd.f32 %v473_v60, %v472_v1 }
 0x1fe   :  { %v475_v0 = vadd.f32 %v474_v62, %v294_v61 }
 0x200   :  { %v478_v3 = vadd.f32 %v477_v63, %v475_v0 }
 0x202   :  { %v526_v4 = vmul.f32 -1.442695, %v478_v3 }
 0x204   :  { %660 = vpow2.f32 %v526_v4 }
 0x20e   :  { %v661_v5 = vpop.eup %660 }
 0x20f   :  { %v482_v52 = vadd.f32 1.0, %v661_v5 }
 0x211   :  { %662 = vrcp.f32 %v482_v52 }
 0x21b   :  { %v663_v7 = vpop.eup %662 }
 0x21c   :  { %485 = vst [vmem:[#allocation3] sm:$0x1] %v663_v7 }
 0x21d   :  { %675 = shalt.err (!%p672_p4)
}
 0x21e   :  { %s676_s26 = scalar_lea.hbm %s874_s4, 16 }
 0x21f   :  { %p677_p5 = scmp.ne.s32.totalorder %s874_s4, %s676_s26  ;;  %p680_p6 = scmp.lt.u32.totalorder %s676_s26, %s874_s4 }
 0x221   :  { %p682_p7 = pnand %p680_p6, %p677_p5 }
 0x223   :  { %685 = shalt.err (!%p682_p7)
}
 0x224   :  { %495 = dma.vmem_to_hbm [thread:$0]  %s493_s22, 16, %s874_s4, [#allocation4]  }
 0x225   :  { %686 = dma.done.wait [#allocation4], 16  }
 0x226   :  { %687 = vsyncadd [#allocation4], 4294967280 }
 0x227   :  { %499 = vsyncpa [#allocation4], 1 }

</bundles_post_ra>
